<compile_context>
chip_gen: v5e
topology: v5e:2x2
jax: 0.10.0
libtpu: 0.0.40
codegen_flags: <defaults>
</compile_context>

<pallas_src>
import jax
import jax.numpy as jnp
from jax.experimental import pallas as pl
from jax.experimental.pallas import tpu as pltpu

LANE = 128      # lane width: hidden dims are zero-padded to this
SUBLANE = 8     # f32 sublane granularity: batch tiles are multiples of 8


def _round_up(a, m):
    return pl.cdiv(a, m) * m


def qnet_kernel(x_ref, w1_ref, w2_ref, w3_ref, b_ref, out_ref):
    """Fused MLP: relu(x@W1+b1) -> relu(.@W2+b2) -> .@W3+b3.

    x block:  (tb, ns_pad)        -- true (sublane-rounded) feature width
    W1 block: (ns_pad, 128)       -- hidden dims padded to the lane width
    W2 block: (128, 128)
    W3 block: (128, n_actions)    -- output kept at the true action count
    b block:  (8, 128)            -- b1/b2/b3 stacked on sublanes 0/1/2
    out:      (tb, n_actions)
    All matmuls accumulate in f32; bias-add / ReLU are done in f32.
    """
    na = out_ref.shape[-1]
    wdt = w1_ref.dtype                      # f32 or bf16 storage dtype
    b = b_ref[...]                          # (8, 128) f32
    b1 = b[0:1, :]
    b2 = b[1:2, :]
    b3 = b[2:3, :na]

    h1 = jnp.dot(x_ref[...], w1_ref[...],
                 preferred_element_type=jnp.float32) + b1
    h1 = jnp.maximum(h1, 0.0).astype(wdt)

    h2 = jnp.dot(h1, w2_ref[...],
                 preferred_element_type=jnp.float32) + b2
    h2 = jnp.maximum(h2, 0.0).astype(wdt)

    q = jnp.dot(h2, w3_ref[...],
                preferred_element_type=jnp.float32) + b3
    out_ref[...] = q.astype(out_ref.dtype)


def prepare_params(params, *, dtype=jnp.float32):
    """One-time padding/stacking of the Q_Net parameters (hoisted per review).

    dtype=jnp.bfloat16 halves HBM/DMA bytes on v6e/v7x (f32 accumulation is
    kept inside the kernel); default f32 matches the PyTorch reference.
    """
    w1, b1 = params["w1"], params["b1"]
    w2, b2 = params["w2"], params["b2"]
    w3, b3 = params["w3"], params["b3"]

    n_states, h1 = w1.shape
    _, h2 = w2.shape
    _, n_actions = w3.shape
    assert h1 <= LANE and h2 <= LANE and n_actions <= LANE, (
        "hidden/action dims > 128 would need extra lane tiling")

    ns_pad = _round_up(n_states, SUBLANE)

    def pad_to(a, rows, cols):
        return jnp.pad(a, ((0, rows - a.shape[0]), (0, cols - a.shape[1])))

    w1p = pad_to(w1, ns_pad, LANE).astype(dtype)
    w2p = pad_to(w2, LANE, LANE).astype(dtype)
    w3p = pad_to(w3, LANE, n_actions).astype(dtype)

    # Biases stay f32 (bias-add/ReLU are done in f32 in-kernel), stacked into
    # a single sublane-aligned (8, 128) buffer -> one resident side input.
    bstack = jnp.zeros((SUBLANE, LANE), jnp.float32)
    bstack = bstack.at[0, :h1].set(b1.reshape(-1).astype(jnp.float32))
    bstack = bstack.at[1, :h2].set(b2.reshape(-1).astype(jnp.float32))
    bstack = bstack.at[2, :n_actions].set(b3.reshape(-1).astype(jnp.float32))

    return {
        "w1": w1p, "w2": w2p, "w3": w3p, "b": bstack,
        "n_states": n_states, "ns_pad": ns_pad, "n_actions": n_actions,
    }


def q_net_forward(x, prep, *, batch_tile=2048):
    """x: (B, N_STATES); returns (B, N_ACTIONS) f32 == PyTorch Q_Net(x)."""
    w1p, w2p, w3p, bstack = prep["w1"], prep["w2"], prep["w3"], prep["b"]
    n_states, ns_pad, n_actions = prep["n_states"], prep["ns_pad"], prep["n_actions"]
    dtype = w1p.dtype

    B = x.shape[0]
    assert x.shape[1] == n_states

    # ---- batch tiling --------------------------------------------------
    b8 = _round_up(B, SUBLANE)
    tb = max(SUBLANE, min(batch_tile, b8))
    if b8 >= 2 * SUBLANE:
        # Keep the grid >= 2 steps so the "parallel" batch axis can be split
        # across both v7x TensorCores (no-op cost on v5e/v6e).
        tb = min(tb, _round_up(pl.cdiv(b8, 2), SUBLANE))
    tb = _round_up(tb, SUBLANE)
    b_pad = _round_up(b8, tb)

    # Only the batch rows get padded per call; the feature dim stays at the
    # true (sublane-rounded) width -> ~8x less streamed input for N_STATES=16.
    xp = jnp.pad(x.astype(dtype), ((0, b_pad - B), (0, ns_pad - n_states)))

    out = pl.pallas_call(
        qnet_kernel,
        out_shape=jax.ShapeDtypeStruct((b_pad, n_actions), jnp.float32),
        grid=(b_pad // tb,),
        in_specs=[
            # activation stream over the batch grid axis (narrow last dim)
            pl.BlockSpec((tb, ns_pad), lambda i: (i, 0)),
            # weights / biases: constant index_map -> pinned in VMEM
            pl.BlockSpec((ns_pad, LANE), lambda i: (0, 0)),
            pl.BlockSpec((LANE, LANE), lambda i: (0, 0)),
            pl.BlockSpec((LANE, n_actions), lambda i: (0, 0)),
            pl.BlockSpec((SUBLANE, LANE), lambda i: (0, 0)),
        ],
        out_specs=pl.BlockSpec((tb, n_actions), lambda i: (i, 0)),
        compiler_params=pltpu.CompilerParams(
            dimension_semantics=("parallel",),
        ),
    )(xp, w1p, w2p, w3p, bstack)

    # Strip batch padding only; action dim is already exact (no zero columns).
    return out[:B]


def init_params(key, n_states, n_actions, h1, h2, std=0.1):
    """normal(0, 0.1) init, matching utils.weights_init_normal in the spec."""
    ks = jax.random.split(key, 6)
    return {
        "w1": jax.random.normal(ks[0], (n_states, h1), jnp.float32) * std,
        "b1": jax.random.normal(ks[1], (1, h1), jnp.float32) * std,
        "w2": jax.random.normal(ks[2], (h1, h2), jnp.float32) * std,
        "b2": jax.random.normal(ks[3], (1, h2), jnp.float32) * std,
        "w3": jax.random.normal(ks[4], (h2, n_actions), jnp.float32) * std,
        "b3": jax.random.normal(ks[5], (1, n_actions), jnp.float32) * std,
    }


def q_net_reference(x, p):
    h1 = jnp.maximum(x @ p["w1"] + p["b1"], 0.0)
    h2 = jnp.maximum(h1 @ p["w2"] + p["b2"], 0.0)
    return h2 @ p["w3"] + p["b3"]


if __name__ == "__main__":
    key = jax.random.PRNGKey(0)
    k_x, k_p, k_big = jax.random.split(key, 3)

    B, N_STATES, N_ACTIONS, H1, H2 = 2, 16, 4, 32, 32
    x = jax.random.normal(k_x, (B, N_STATES), jnp.float32)
    params = init_params(k_p, N_STATES, N_ACTIONS, H1, H2)

    # Pad / stack parameters ONCE (hoisted out of the forward path).
    prep_f32 = prepare_params(params)                       # exact-parity path

    # Small-batch action-selection path (original module shapes).
    out = q_net_forward(x, prep_f32)
    jax.block_until_ready(out)
    ref = q_net_reference(x, params)
    assert out.shape == (B, N_ACTIONS)
    assert jnp.allclose(out, ref, atol=1e-5, rtol=1e-5), "mismatch vs reference"

    # Large replay-batch path: exercises the multi-step parallel grid
    # (>= 2 steps so both v7x TensorCores get work) with pinned weights.
    xb = jax.random.normal(k_big, (1024, N_STATES), jnp.float32)
    outb = q_net_forward(xb, prep_f32)
    jax.block_until_ready(outb)
    refb = q_net_reference(xb, params)
    assert outb.shape == (1024, N_ACTIONS)
    assert jnp.allclose(outb, refb, atol=1e-4, rtol=1e-4), "mismatch (big batch)"

    # bf16 storage path (v6e/v7x DMA-byte saving): f32 accumulation in-kernel,
    # looser tolerance only because inputs/weights are stored in bf16.
    prep_bf16 = prepare_params(params, dtype=jnp.bfloat16)
    outb16 = q_net_forward(xb, prep_bf16)
    jax.block_until_ready(outb16)
    assert outb16.shape == (1024, N_ACTIONS)
    assert jnp.allclose(outb16, refb, atol=5e-2, rtol=5e-2), "mismatch (bf16)"

    print("KERNEL_OK")
</pallas_src>

<mosaic_0001>
module attributes {stable_mosaic.version = 11 : i64} {
  func.func @qnet_kernel(%arg0: i32, %arg1: memref<8x16xf32, #tpu.memory_space<vmem>>, %arg2: memref<16x128xf32, #tpu.memory_space<vmem>>, %arg3: memref<128x128xf32, #tpu.memory_space<vmem>>, %arg4: memref<128x4xf32, #tpu.memory_space<vmem>>, %arg5: memref<8x128xf32, #tpu.memory_space<vmem>>, %arg6: memref<8x4xf32, #tpu.memory_space<vmem>>) attributes {dimension_semantics = [#tpu.dimension_semantics<parallel>], iteration_bounds = array<i64: 1>, scalar_prefetch = 0 : i64, scratch_operands = 0 : i64, tpu.core_type = #tpu.core_type<tc>, window_params = [{transform_indices = @transform_0, window_bounds = array<i64: 8, 16>}, {pipeline_mode = #tpu.pipeline_mode<synchronous>, transform_indices = @transform_1, window_bounds = array<i64: 16, 128>}, {pipeline_mode = #tpu.pipeline_mode<synchronous>, transform_indices = @transform_2, window_bounds = array<i64: 128, 128>}, {pipeline_mode = #tpu.pipeline_mode<synchronous>, transform_indices = @transform_3, window_bounds = array<i64: 128, 4>}, {pipeline_mode = #tpu.pipeline_mode<synchronous>, transform_indices = @transform_4, window_bounds = array<i64: 8, 128>}, {transform_indices = @transform_5, window_bounds = array<i64: 8, 4>}]} {
    %c0 = arith.constant 0 : index
    %c0_0 = arith.constant 0 : index
    %0 = vector.load %arg5[%c0, %c0_0] : memref<8x128xf32, #tpu.memory_space<vmem>>, vector<8x128xf32>
    %1 = vector.extract_strided_slice %0 {offsets = [0, 0], sizes = [1, 128], strides = [1, 1]} : vector<8x128xf32> to vector<1x128xf32>
    %2 = vector.extract_strided_slice %0 {offsets = [1, 0], sizes = [1, 128], strides = [1, 1]} : vector<8x128xf32> to vector<1x128xf32>
    %3 = vector.extract_strided_slice %0 {offsets = [2, 0], sizes = [1, 4], strides = [1, 1]} : vector<8x128xf32> to vector<1x4xf32>
    %c0_1 = arith.constant 0 : index
    %c0_2 = arith.constant 0 : index
    %4 = vector.load %arg1[%c0_1, %c0_2] : memref<8x16xf32, #tpu.memory_space<vmem>>, vector<8x16xf32>
    %c0_3 = arith.constant 0 : index
    %c0_4 = arith.constant 0 : index
    %5 = vector.load %arg2[%c0_3, %c0_4] : memref<16x128xf32, #tpu.memory_space<vmem>>, vector<16x128xf32>
    %cst = arith.constant dense<0.000000e+00> : vector<8x128xf32>
    %6 = tpu.matmul %4, %5, %cst {dimension_numbers = #tpu.dot_dimension_numbers<[1], [0], [0], [1], [0, 0, 1, 1], [], []>} : vector<8x16xf32>, vector<16x128xf32>, vector<8x128xf32> -> vector<8x128xf32>
    %7 = vector.broadcast %1 : vector<1x128xf32> to vector<8x128xf32>
    %8 = arith.addf %6, %7 : vector<8x128xf32>
    %cst_5 = arith.constant 0.000000e+00 : f32
    %9 = vector.broadcast %cst_5 : f32 to vector<8x128xf32>
    %10 = arith.maximumf %8, %9 : vector<8x128xf32>
    %c0_6 = arith.constant 0 : index
    %c0_7 = arith.constant 0 : index
    %11 = vector.load %arg3[%c0_6, %c0_7] : memref<128x128xf32, #tpu.memory_space<vmem>>, vector<128x128xf32>
    %cst_8 = arith.constant dense<0.000000e+00> : vector<8x128xf32>
    %12 = tpu.matmul %10, %11, %cst_8 {dimension_numbers = #tpu.dot_dimension_numbers<[1], [0], [0], [1], [0, 0, 1, 1], [], []>} : vector<8x128xf32>, vector<128x128xf32>, vector<8x128xf32> -> vector<8x128xf32>
    %13 = vector.broadcast %2 : vector<1x128xf32> to vector<8x128xf32>
    %14 = arith.addf %12, %13 : vector<8x128xf32>
    %cst_9 = arith.constant 0.000000e+00 : f32
    %15 = vector.broadcast %cst_9 : f32 to vector<8x128xf32>
    %16 = arith.maximumf %14, %15 : vector<8x128xf32>
    %c0_10 = arith.constant 0 : index
    %c0_11 = arith.constant 0 : index
    %17 = vector.load %arg4[%c0_10, %c0_11] : memref<128x4xf32, #tpu.memory_space<vmem>>, vector<128x4xf32>
    %cst_12 = arith.constant dense<0.000000e+00> : vector<8x4xf32>
    %18 = tpu.matmul %16, %17, %cst_12 {dimension_numbers = #tpu.dot_dimension_numbers<[1], [0], [0], [1], [0, 0, 1, 1], [], []>} : vector<8x128xf32>, vector<128x4xf32>, vector<8x4xf32> -> vector<8x4xf32>
    %19 = vector.broadcast %3 : vector<1x4xf32> to vector<8x4xf32>
    %20 = arith.addf %18, %19 : vector<8x4xf32>
    %c0_13 = arith.constant 0 : index
    %c0_14 = arith.constant 0 : index
    %21 = vector.load %arg6[%c0_13, %c0_14] : memref<8x4xf32, #tpu.memory_space<vmem>>, vector<8x4xf32>
    tpu.vector_store %arg6[%c0_13, %c0_14], %20 {strides = array<i32>} : memref<8x4xf32, #tpu.memory_space<vmem>>, vector<8x4xf32>,
    return
  }
  func.func @transform_0(%arg0: i32) -> (i32, i32) {
    %c0_i32 = arith.constant 0 : i32
    %c0_i32_0 = arith.constant 0 : i32
    return %arg0, %c0_i32 : i32, i32
  }
  func.func @transform_1(%arg0: i32) -> (i32, i32) {
    %c0_i32 = arith.constant 0 : i32
    %c0_i32_0 = arith.constant 0 : i32
    %c0_i32_1 = arith.constant 0 : i32
    return %c0_i32, %c0_i32_0 : i32, i32
  }
  func.func @transform_2(%arg0: i32) -> (i32, i32) {
    %c0_i32 = arith.constant 0 : i32
    %c0_i32_0 = arith.constant 0 : i32
    %c0_i32_1 = arith.constant 0 : i32
    return %c0_i32, %c0_i32_0 : i32, i32
  }
  func.func @transform_3(%arg0: i32) -> (i32, i32) {
    %c0_i32 = arith.constant 0 : i32
    %c0_i32_0 = arith.constant 0 : i32
    %c0_i32_1 = arith.constant 0 : i32
    return %c0_i32, %c0_i32_0 : i32, i32
  }
  func.func @transform_4(%arg0: i32) -> (i32, i32) {
    %c0_i32 = arith.constant 0 : i32
    %c0_i32_0 = arith.constant 0 : i32
    %c0_i32_1 = arith.constant 0 : i32
    return %c0_i32, %c0_i32_0 : i32, i32
  }
  func.func @transform_5(%arg0: i32) -> (i32, i32) {
    %c0_i32 = arith.constant 0 : i32
    %c0_i32_0 = arith.constant 0 : i32
    return %arg0, %c0_i32 : i32, i32
  }
}

</mosaic_0001>

<bundles_post_ra>
// kernel: tpu_custom_call.1
= control target key start
LH: loop header
LB: loop body
LE: loop exit
PB: predicated region body
PF: predicated region fallthrough
CT: control target
= control target key end

     0   :  { %10 = vsyncpa [#allocation3], 0  ;;  %s401_s0 = inlined_call_operand.hbm [shape: f32[8,16], index: 0, kind: input, shape index: {}]   ;;  %s402_s1 = inlined_call_operand.hbm [shape: f32[16,128], index: 1, kind: input, shape index: {}]   ;;  %s403_s2 = inlined_call_operand.vmem [shape: f32[128,128], index: 2, kind: input, shape index: {}]   ;;  %s404_s3 = inlined_call_operand.vmem [shape: f32[128,4], index: 3, kind: input, shape index: {}]   ;;  %s405_s4 = inlined_call_operand.hbm [shape: f32[8,128], index: 4, kind: input, shape index: {}]   ;;  %s406_s5 = inlined_call_operand.vmem [shape: f32[8,4], index: 5, kind: output, shape index: {}]  }
   0x1   :  { %11 = vsyncpa [#allocation5], 0  ;;  %s27_s20 = sshll.u32 %s402_s1, 4  ;;  %s258_s21 = smov [#allocation4]   ;;  %s28_s20 = int_to_ptr.hbm [resolvable:$true] %s27_s20 }
   0x2   :  { %s29_s22 = sshll.u32 %s258_s21, 4  ;;  %s17_s25 = sshll.u32 %s401_s0, 4  ;;  %s30_s22 = int_to_ptr.vmem [resolvable:$true] %s29_s22  ;;  %s18_s25 = int_to_ptr.hbm [resolvable:$true] %s17_s25 }
   0x3   :  { %s259_s26 = smov 128   ;;  %s260_s27 = smov 8  }
   0x4   :  { %35 = dma.hbm_to_vmem [thread:$0]  %s28_s20, 256, %s30_s22, [#allocation5], %s259_s26, %s259_s26, %s260_s27  }
   0x5   :  { %s261_s28 = smov [#allocation2]   ;;  %s45_s7 = sshll.u32 %s405_s4, 4  ;;  %s46_s7 = int_to_ptr.hbm [resolvable:$true] %s45_s7 }
   0x6   :  { %s19_s29 = sshll.u32 %s261_s28, 4  ;;  %s262_s1 = smov [#allocation6]   ;;  %s20_s29 = int_to_ptr.vmem [resolvable:$true] %s19_s29 }
   0x7   :  { %22 = dma.hbm_to_vmem [thread:$0]  %s18_s25, 128, %s20_s29, [#allocation3]  }
   0x8   :  { %s47_s8 = sshll.u32 %s262_s1, 4  ;;  %s48_s8 = int_to_ptr.vmem [resolvable:$true] %s47_s8 }
   0x9   :  { %50 = dma.hbm_to_vmem [thread:$0]  %s46_s7, 128, %s48_s8, [#allocation5]  }
   0xa   :  { %254 = dma.done.wait [#allocation3], 128  }
   0xb   :  { %255 = vsyncadd [#allocation3], 4294967168 }
   0xc   :  { %256 = dma.done.wait [#allocation5], 384  }
   0xd   :  { %257 = vsyncadd [#allocation5], 4294966912  ;;  %v66_v0 = vld [vmem:[#allocation4 + $0x8] sm:$0xff]  ;;  %v65_v1 = vld [vmem:[#allocation4] sm:$0xff]  ;;  %vm68_vm0 = vcmask 130048   ;;  %vm168_vm1 = vcmask 31744  }
   0xe   :  { %86 = vmatpush.msra.mxu0 %v66_v0  ;;  %v64_v2 = vld [vmem:[#allocation2] sm:$0xff]  ;;  %v108_v3 = vld [vmem:[%s403_s2 + $0x78] sm:$0xff]  ;;  %v107_v4 = vld [vmem:[%s403_s2 + $0x70] sm:$0xff] }
   0xf   :  { %110 = vmatpush.msra.mxu1 %v108_v3  ;;  %v106_v5 = vld [vmem:[%s403_s2 + $0x68] sm:$0xff]  ;;  %v105_v6 = vld [vmem:[%s403_s2 + $0x60] sm:$0xff]  ;;  %v104_v7 = vld [vmem:[%s403_s2 + $0x58] sm:$0xff] }
  0x10   :  { %87 = vmatpush.msra.mxu0 %v65_v1  ;;  %v103_v8 = vld [vmem:[%s403_s2 + $0x50] sm:$0xff]  ;;  %v102_v9 = vld [vmem:[%s403_s2 + $0x48] sm:$0xff]  ;;  %v101_v10 = vld [vmem:[%s403_s2 + $0x40] sm:$0xff] }
  0x11   :  { %176 = vmatmul.msk.f32.vlgmr.msra.gmra.mxu0 %vm68_vm0, %v64_v2  ;;  %111 = vmatpush.msra.mxu1 %v107_v4  ;;  %v100_v11 = vld [vmem:[%s403_s2 + $0x38] sm:$0xff]  ;;  %v99_v12 = vld [vmem:[%s403_s2 + $0x30] sm:$0xff]  ;;  %v98_v13 = vld [vmem:[%s403_s2 + $0x28] sm:$0xff] }
  0x12   :  { %v97_v14 = vld [vmem:[%s403_s2 + $0x20] sm:$0xff]  ;;  %v96_v15 = vld [vmem:[%s403_s2 + $0x18] sm:$0xff]  ;;  %v95_v16 = vld [vmem:[%s403_s2 + $0x10] sm:$0xff] }
  0x13   :  { %112 = vmatpush.msra.mxu1 %v106_v5  ;;  %v94_v17 = vld [vmem:[%s403_s2 + $0x8] sm:$0xff]  ;;  %v93_v18 = vld [vmem:[%s403_s2] sm:$0xff]  ;;  %v146_v19 = vld [vmem:[%s404_s3 + $0x78] sm:$0xff] }
  0x14   :  { %v145_v20 = vld [vmem:[%s404_s3 + $0x70] sm:$0xff]  ;;  %148 = vmatpush.msra.mxu2 %v146_v19  ;;  %v144_v21 = vld [vmem:[%s404_s3 + $0x68] sm:$0xff]  ;;  %v143_v22 = vld [vmem:[%s404_s3 + $0x60] sm:$0xff] }
  0x15   :  { %113 = vmatpush.msra.mxu1 %v105_v6  ;;  %v142_v23 = vld [vmem:[%s404_s3 + $0x58] sm:$0xff]  ;;  %v141_v24 = vld [vmem:[%s404_s3 + $0x50] sm:$0xff]  ;;  %v140_v25 = vld [vmem:[%s404_s3 + $0x48] sm:$0xff] }
  0x16   :  { %149 = vmatpush.msra.mxu2 %v145_v20  ;;  %v139_v26 = vld [vmem:[%s404_s3 + $0x40] sm:$0xff]  ;;  %v138_v27 = vld [vmem:[%s404_s3 + $0x38] sm:$0xff]  ;;  %v137_v28 = vld [vmem:[%s404_s3 + $0x30] sm:$0xff] }
  0x17   :  { %114 = vmatpush.msra.mxu1 %v104_v7  ;;  %v136_v29 = vld [vmem:[%s404_s3 + $0x28] sm:$0xff]  ;;  %v135_v30 = vld [vmem:[%s404_s3 + $0x20] sm:$0xff]  ;;  %v63_v31 = vld [vmem:[#allocation6] sm:$0xff] }
  0x18   :  { %150 = vmatpush.msra.mxu2 %v144_v21  ;;  %v134_v32 = vld [vmem:[%s404_s3 + $0x18] sm:$0xff]  ;;  %v67_v33 = vperm.slane %v63_v31, 0  ;;  %v133_v37 = vld [vmem:[%s404_s3 + $0x10] sm:$0xff]  ;;  %v132_v38 = vld [vmem:[%s404_s3 + $0x8] sm:$0xff]  ;;  %v109_v40 = vperm.slane %v63_v31, 1  ;;  %v147_v44 = vperm.slane %v63_v31, 2 }
  0x19   :  { %115 = vmatpush.msra.mxu1 %v103_v8  ;;  %v131_v39 = vld [vmem:[%s404_s3] sm:$0xff] }
  0x1a   :  { %151 = vmatpush.msra.mxu2 %v143_v22 }
  0x1b   :  { %116 = vmatpush.msra.mxu1 %v102_v9 }
  0x1c   :  { %152 = vmatpush.msra.mxu2 %v142_v23 }
  0x1d   :  { %117 = vmatpush.msra.mxu1 %v101_v10 }
  0x1e   :  { %153 = vmatpush.msra.mxu2 %v141_v24 }
  0x1f   :  { %118 = vmatpush.msra.mxu1 %v100_v11 }
  0x20   :  { %154 = vmatpush.msra.mxu2 %v140_v25 }
  0x21   :  { %119 = vmatpush.msra.mxu1 %v99_v12 }
  0x22   :  { %155 = vmatpush.msra.mxu2 %v139_v26 }
  0x23   :  { %120 = vmatpush.msra.mxu1 %v98_v13 }
  0x24   :  { %156 = vmatpush.msra.mxu2 %v138_v27 }
  0x25   :  { %121 = vmatpush.msra.mxu1 %v97_v14 }
  0x26   :  { %157 = vmatpush.msra.mxu2 %v137_v28 }
  0x27   :  { %122 = vmatpush.msra.mxu1 %v96_v15 }
  0x28   :  { %158 = vmatpush.msra.mxu2 %v136_v29 }
  0x29   :  { %123 = vmatpush.msra.mxu1 %v95_v16 }
  0x2a   :  { %159 = vmatpush.msra.mxu2 %v135_v30 }
  0x2b   :  { %124 = vmatpush.msra.mxu1 %v94_v17 }
  0x2c   :  { %160 = vmatpush.msra.mxu2 %v134_v32 }
  0x2d   :  { %125 = vmatpush.msra.mxu1 %v93_v18 }
  0x2e   :  { %161 = vmatpush.msra.mxu2 %v133_v37 }
  0x30   :  { %162 = vmatpush.msra.mxu2 %v132_v38 }
  0x32   :  { %163 = vmatpush.msra.mxu2 %v131_v39 }
  0x8e   :  { %v89_v34 = vpop.f32.mrf.mxu0 }
  0x8f   :  { %v90_v35 = vadd.f32 %v89_v34, %v67_v33 }
  0x91   :  { %v92_v36 = vmax.f32 %v90_v35, 0.0 }
  0x93   :  { %126 = vmatmul.f32.vlgmr.msra.gmra.mxu1 %v92_v36 }
 0x110   :  { %v127_v41 = vpop.f32.mrf.mxu1 }
 0x111   :  { %v128_v42 = vadd.f32 %v127_v41, %v109_v40 }
 0x113   :  { %v130_v43 = vmax.f32 %v128_v42, 0.0 }
 0x115   :  { %164 = vmatmul.f32.vlgmr.msra.gmra.mxu2 %v130_v43 }
 0x198   :  { %v165_v45 = vpop.f32.mrf.mxu2 }
 0x199   :  { %v166_v46 = vadd.f32 %v165_v45, %v147_v44 }
 0x19b   :  { %169 = vst.msk [vmem:[%s406_s5] sm:$0xff] %vm168_vm1, %v166_v46 }
 0x19c   :  { %174 = vsyncpa [#allocation3], 1 }
 0x19d   :  { %175 = vsyncpa [#allocation5], 1 }

</bundles_post_ra>
